<compile_context>
chip_gen: v7x
topology: tpu7x:2x2x1
jax: 0.10.0
libtpu: 0.0.40
codegen_flags: <defaults>
</compile_context>

<pallas_src>
import jax
import jax.numpy as jnp
from jax.experimental import pallas as pl
from jax.experimental.pallas import tpu as pltpu


def _i1_to_f32_kernel(x_ref, o_ref):
    # Elementwise bool -> float32 conversion: single VPU convert per vreg.
    o_ref[...] = x_ref[...].astype(o_ref.dtype)


# Double-buffered pipeline footprint per element: (1 B bool + 4 B f32) * 2.
_BYTES_PER_ELEM_PIPELINED = 10
# Target ~1M elements (~4 MiB of f32 output) per tile: on the measured
# HBM-roofline plateau, while keeping many grid steps for pipelining.
_TARGET_TILE_ELEMS = 1024 * 1024
# Below this element count a single block (no grid) beats any tiling.
_SMALL_BLOCK_ELEMS = 128 * 1024
# Scoped-VMEM limit we request (safe on v5e/v6e/v7x; v7x default is 32 MiB).
_VMEM_LIMIT_BYTES = 32 * 1024 * 1024


def _vmem_budget_bytes() -> int:
    """Byte budget for the double-buffered in+out tiles, generation aware."""
    try:
        cap = getattr(pltpu.get_tpu_info(), "vmem_capacity_bytes", None)
    except Exception:
        cap = None
    if cap is None:
        return 12 * 1024 * 1024          # unknown chip: stay conservative
    if cap <= 64 * 1024 * 1024:
        return 20 * 1024 * 1024          # v7x: 64 MiB physical, leave headroom
    return 24 * 1024 * 1024              # v5e / v6e: 128 MiB physical


def _choose_tile_rows(rows: int, cols: int, requested, budget: int) -> int:
    """Row tile: multiple of 32 (packed-bool sublane tile), capped by bytes."""
    budget_rows = max(
        32, (budget // _BYTES_PER_ELEM_PIPELINED // max(cols, 1)) // 32 * 32)
    if requested is not None:
        tr = max(32, (int(requested) // 32) * 32)
        return min(tr, budget_rows)      # clamp user request against VMEM budget
    target_rows = max(32, (_TARGET_TILE_ELEMS // max(cols, 1)) // 32 * 32)
    tr = min(budget_rows, target_rows)
    # Force >= ~4 grid steps so DMA-in / convert / DMA-out can pipeline.
    if rows >= 4 * 32:
        tr = min(tr, max(32, (rows // 4) // 32 * 32))
    return tr


def i1_to_f64(x: jax.Array, tile_rows: int | None = None) -> jax.Array:
    """Pallas implementation of `x.to(torch.float64)` for a 2-D bool array."""
    assert x.ndim == 2 and x.dtype == jnp.bool_
    rows, cols = x.shape
    nelems = rows * cols
    budget = _vmem_budget_bytes()

    cost = pl.CostEstimate(flops=0, transcendentals=0,
                           bytes_accessed=nelems * 5)

    # --- Tiny input: one full-array block, no grid overhead. -----------------
    if nelems <= _SMALL_BLOCK_ELEMS:
        out_f32 = pl.pallas_call(
            _i1_to_f32_kernel,
            out_shape=jax.ShapeDtypeStruct((rows, cols), jnp.float32),
            in_specs=[pl.BlockSpec((rows, cols), lambda: (0, 0))],
            out_specs=pl.BlockSpec((rows, cols), lambda: (0, 0)),
            cost_estimate=cost,
        )(x)
        return out_f32.astype(jnp.float64)

    row_block_bytes = 32 * cols * _BYTES_PER_ELEM_PIPELINED

    if rows >= 32 and row_block_bytes <= budget:
        # --- Row tiling with full-width (lane-dense) blocks. -----------------
        tr = _choose_tile_rows(rows, cols, tile_rows, budget)
        out_f32 = pl.pallas_call(
            _i1_to_f32_kernel,
            out_shape=jax.ShapeDtypeStruct((rows, cols), jnp.float32),
            grid=(pl.cdiv(rows, tr),),
            in_specs=[pl.BlockSpec((tr, cols), lambda i: (i, 0))],
            out_specs=pl.BlockSpec((tr, cols), lambda i: (i, 0)),
            compiler_params=pltpu.CompilerParams(
                dimension_semantics=("parallel",),
                vmem_limit_bytes=_VMEM_LIMIT_BYTES),
            cost_estimate=cost,
        )(x)
    else:
        # --- Column-tiling fallback: very wide (or very short+wide) inputs. --
        tr = 32 if rows >= 32 else rows
        tc_cap = min(budget // max(tr * _BYTES_PER_ELEM_PIPELINED, 1),
                     _TARGET_TILE_ELEMS // max(tr, 1))
        tc = max(128, (tc_cap // 128) * 128)
        if tc >= cols:
            tc = cols
        out_f32 = pl.pallas_call(
            _i1_to_f32_kernel,
            out_shape=jax.ShapeDtypeStruct((rows, cols), jnp.float32),
            grid=(pl.cdiv(rows, tr), pl.cdiv(cols, tc)),
            in_specs=[pl.BlockSpec((tr, tc), lambda i, j: (i, j))],
            out_specs=pl.BlockSpec((tr, tc), lambda i, j: (i, j)),
            compiler_params=pltpu.CompilerParams(
                dimension_semantics=("parallel", "parallel"),
                vmem_limit_bytes=_VMEM_LIMIT_BYTES),
            cost_estimate=cost,
        )(x)

    # Requested output dtype is float64; under JAX's default (x64 disabled)
    # this resolves to float32 with identical 0.0/1.0 values.
    return out_f32.astype(jnp.float64)


if __name__ == "__main__":
    key = jax.random.PRNGKey(0)
    k1, k2, k3, k4 = jax.random.split(key, 4)

    # Small dynamic-shaped bool inputs consistent with the module ([-1, -1]).
    x_small = jax.random.bernoulli(k1, p=0.5, shape=(16, 128))     # single block
    x_ragged = jax.random.bernoulli(k2, p=0.5, shape=(70, 192))    # single block, odd shape
    x_wide = jax.random.bernoulli(k3, p=0.5, shape=(8, 384))       # short rows
    x_tiled = jax.random.bernoulli(k4, p=0.5, shape=(512, 512))    # multi-tile row path

    ok = True
    for x in (x_small, x_ragged, x_wide, x_tiled):
        y = i1_to_f64(x)
        jax.block_until_ready(y)
        ok &= y.shape == x.shape
        ok &= bool(jnp.all(y.astype(jnp.float32) == x.astype(jnp.float32)))

    # Also exercise a caller-supplied tile_rows (clamped against the budget).
    y_override = i1_to_f64(x_tiled, tile_rows=64)
    jax.block_until_ready(y_override)
    ok &= bool(jnp.all(y_override.astype(jnp.float32)
                       == x_tiled.astype(jnp.float32)))

    assert ok
    print("KERNEL_OK")
</pallas_src>

<mosaic_0001>
module attributes {stable_mosaic.version = 11 : i64} {
  func.func @_i1_to_f32_kernel(%arg0: memref<16x128xi32, #tpu.memory_space<vmem>>, %arg1: memref<16x128xf32, #tpu.memory_space<vmem>>) attributes {dimension_semantics = [], scalar_prefetch = 0 : i64, scratch_operands = 0 : i64, tpu.core_type = #tpu.core_type<tc>} {
    %c0 = arith.constant 0 : index
    %c0_0 = arith.constant 0 : index
    %0 = vector.load %arg0[%c0, %c0_0] : memref<16x128xi32, #tpu.memory_space<vmem>>, vector<16x128xi32>
    %cst = arith.constant dense<0> : vector<16x128xi32>
    %1 = arith.cmpi ne, %0, %cst : vector<16x128xi32>
    %2 = arith.extui %1 : vector<16x128xi1> to vector<16x128xi32>
    %3 = arith.sitofp %2 : vector<16x128xi32> to vector<16x128xf32>
    %c0_1 = arith.constant 0 : index
    %c0_2 = arith.constant 0 : index
    %4 = vector.load %arg1[%c0_1, %c0_2] : memref<16x128xf32, #tpu.memory_space<vmem>>, vector<16x128xf32>
    tpu.vector_store %arg1[%c0_1, %c0_2], %3 {strides = array<i32>} : memref<16x128xf32, #tpu.memory_space<vmem>>, vector<16x128xf32>,
    return
  }
}

</mosaic_0001>

<bundles_post_ra>
// kernel: tpu_custom_call.1
= control target key start
LH: loop header
LB: loop body
LE: loop exit
PB: predicated region body
PF: predicated region fallthrough
CT: control target
= control target key end

     0   :  { %s97_s0 = inlined_call_operand.vmem [shape: s32[16,128], index: 0, kind: input, shape index: {}]   ;;  %s98_s1 = inlined_call_operand.hbm [shape: f32[16,128], index: 1, kind: output, shape index: {}]  }
   0x1   :  { %v9_v0 = vld [vmem:[%s97_s0] sm:$0xff]  ;;  %v10_v1 = vld [vmem:[%s97_s0 + $0x8] sm:$0xff] }
   0x2   :  { %6 = vsyncpa [#allocation3], 0  ;;  %vm11_vm0 = vcmp.ne.s32.totalorder %v9_v0, 0  ;;  %vm12_vm1 = vcmp.ne.s32.totalorder %v10_v1, 0  ;;  %s65_s10 = smov [#allocation2]   ;;  %v66_v2 = vmov 0.0  }
   0x3   :  { %s24_s11 = sshll.u32 %s65_s10, 4  ;;  %v35_v3 = vsel %vm11_vm0, 1.0, %v66_v2  ;;  %v36_v4 = vsel %vm12_vm1, 1.0, %v66_v2  ;;  %s25_s11 = int_to_ptr.vmem [resolvable:$true] %s24_s11 }
   0x4   :  { %17 = vst [vmem:[#allocation2] sm:$0xff] %v35_v3  ;;  %18 = vst [vmem:[#allocation2 + $0x8] sm:$0xff] %v36_v4  ;;  %s41_s12 = scalar_lea.vmem %s25_s11, 256  ;;  %p46_p1 = scmp.lt.s32.totalorder %s25_s11, %s25_s11 }
   0x5   :  { %p42_p0 = scmp.ne.s32.totalorder %s25_s11, %s41_s12  ;;  %p47_p2 = scmp.lt.s32.totalorder %s41_s12, %s41_s12 }
   0x7   :  { %p48_p3 = por %p47_p2, %p46_p1 }
   0x9   :  { %p49_p4 = pnand %p48_p3, %p42_p0 }
   0xb   :  { %52 = shalt.err (!%p49_p4)
}
   0xc   :  { %s53_s14 = scalar_lea.hbm %s98_s1, 256 }
   0xd   :  { %p54_p5 = scmp.ne.s32.totalorder %s98_s1, %s53_s14  ;;  %p57_p6 = scmp.lt.u32.totalorder %s53_s14, %s98_s1 }
   0xf   :  { %p59_p7 = pnand %p57_p6, %p54_p5 }
  0x11   :  { %62 = shalt.err (!%p59_p7)
}
  0x12   :  { %s67_s19 = smov 128   ;;  %s68_s20 = smov 8  }
  0x13   :  { %30 = dma.vmem_to_hbm [thread:$0]  %s25_s11, 256, %s98_s1, [#allocation3], %s67_s19, %s67_s19, %s68_s20  }
  0x14   :  { %63 = dma.done.wait [#allocation3], 256  }
  0x15   :  { %64 = vsyncadd [#allocation3], 4294967040 }
  0x16   :  { %34 = vsyncpa [#allocation3], 1 }

</bundles_post_ra>
